<compile_context>
chip_gen: v6e
topology: v6e:2x2x1
jax: 0.10.0
libtpu: 0.0.40
codegen_flags: <defaults>
</compile_context>

<pallas_src>
import functools

import jax
import jax.numpy as jnp
import numpy as np
from jax import lax
from jax.experimental import pallas as pl
from jax.experimental.pallas import tpu as pltpu


def _round_up(x: int, m: int) -> int:
    return ((x + m - 1) // m) * m


def _rank_count_kernel(anch_ref, cols_ref, spos_ref, cnt_ref, *, eps, n_valid, tm, tn):
    """One (TN columns) x (TM anchors) tile of the similarity matrix.

    For every anchor lane, counts the columns whose cosine similarity to the
    anchor is strictly greater than the anchor<->positive similarity (== cosine
    distance strictly smaller), excluding the anchor's own column, the positive
    column and any padding columns.  Accumulates into the lane-dense output
    block across the column (reduction) grid axis.
    """
    i = pl.program_id(0)          # anchor tile index
    j = pl.program_id(1)          # column tile index (reduction axis)

    @pl.when(j == 0)
    def _():
        cnt_ref[...] = jnp.zeros_like(cnt_ref)

    # (tn, tm) similarity tile on the MXU: contract the embedding dim of both
    # operands directly (q @ k.T pattern); bf16 inputs, f32 accumulation.
    sim = lax.dot_general(
        cols_ref[...], anch_ref[...],
        dimension_numbers=(((1,), (1,)), ((), ())),
        preferred_element_type=jnp.float32)

    # Global column index lives on sublanes, global anchor index on lanes.
    col_g = j * tn + lax.broadcasted_iota(jnp.int32, (tn, 1), 0)      # (tn, 1)
    anc_g = i * tm + lax.broadcasted_iota(jnp.int32, (1, tm), 1)      # (1, tm)
    self_col = anc_g * eps                                            # (1, tm)

    valid = ((col_g != self_col)
             & (col_g != self_col + 1)
             & (col_g < n_valid))                                     # (tn, tm)

    hit = jnp.logical_and(valid, sim > spos_ref[...])                 # (tn, tm)
    cnt_ref[...] += jnp.sum(hit.astype(jnp.float32), axis=0, keepdims=True)


def _pallas_rank_counts(embeddings: jnp.ndarray, eps: int, *, tm: int = 256,
                        tn: int = 512) -> jnp.ndarray:
    """Returns the positive-example rank for every anchor row (int32, shape (N//eps,))."""
    e = embeddings.astype(jnp.float32)
    n, d = e.shape
    na = n // eps
    if na == 0:
        return jnp.zeros((0,), jnp.int32)

    # F.normalize(p=2, dim=1): v / max(||v||_2, 1e-12), done once in plain JAX (O(N*D)).
    norm = jnp.sqrt(jnp.sum(e * e, axis=-1, keepdims=True))
    en = e / jnp.maximum(norm, 1e-12)

    # bf16 copies feed the MXU; the per-anchor threshold stays in f32, computed
    # from the same bf16-quantized values the kernel sees so the strict ">"
    # comparison is internally consistent (positive/self are also explicitly
    # excluded in-kernel, so duplicates cannot shift the rank).
    en_bf = en.astype(jnp.bfloat16)
    anchors = en_bf[0:na * eps:eps]                                   # (na, d)
    positives = en_bf[1:na * eps:eps]                                 # (na, d)
    sim_pos = jnp.sum(anchors.astype(jnp.float32) * positives.astype(jnp.float32),
                      axis=-1)                                        # (na,)

    tm = min(tm, _round_up(na, 128))
    tn = min(tn, _round_up(n, 128))
    na_pad = _round_up(na, tm)
    n_pad = _round_up(n, tn)

    anchors_p = jnp.zeros((na_pad, d), jnp.bfloat16).at[:na].set(anchors)
    cols_p = jnp.zeros((n_pad, d), jnp.bfloat16).at[:n].set(en_bf)
    # Padded anchor lanes get a threshold larger than any cosine similarity.
    spos_p = jnp.full((1, na_pad), 2.0, jnp.float32).at[0, :na].set(sim_pos)

    kernel = functools.partial(_rank_count_kernel, eps=eps, n_valid=n, tm=tm, tn=tn)
    counts = pl.pallas_call(
        kernel,
        out_shape=jax.ShapeDtypeStruct((1, na_pad), jnp.float32),
        grid_spec=pltpu.PrefetchScalarGridSpec(
            num_scalar_prefetch=0,
            grid=(na_pad // tm, n_pad // tn),
            in_specs=[
                pl.BlockSpec((tm, d), lambda i, j: (i, 0)),   # anchor rows (bf16)
                pl.BlockSpec((tn, d), lambda i, j: (j, 0)),   # all rows as columns (bf16)
                pl.BlockSpec((1, tm), lambda i, j: (0, i)),   # f32 thresholds, lane-dense
            ],
            out_specs=pl.BlockSpec((1, tm), lambda i, j: (0, i)),  # lane-dense counts
        ),
        compiler_params=pltpu.CompilerParams(
            dimension_semantics=("parallel", "arbitrary")),
    )(anchors_p, cols_p, spos_p)

    # Count already excludes self and positive => it IS the torch rank (argsort
    # position of the positive minus 1), up to arbitrary tie-breaking.
    return counts[0, :na].astype(jnp.int32)


class EmbeddingsDistance:
    """JAX/Pallas re-implementation of the PyTorch metric module."""

    def __init__(self, include_negative: bool = False, mode: str = "train"):
        self.mode = mode
        self.examplesPerSequence = 3 if include_negative else 2
        self.allEmbeddings = []

    def forward(self, criterionOutput, networkOutput, batch):
        # Same semantics as the torch forward(): accumulate embeddings per batch.
        self.allEmbeddings.append(networkOutput)
        # TODO(synk): pickling of batch['epoch_data'] / ranks / embeddings to disk
        # (SAVE_EPOCH_DATA) and Logger output are file/console I/O with no kernel
        # equivalent and are intentionally omitted.

    def calculate_MedR(self):
        epoch_embeddings = jnp.concatenate(self.allEmbeddings, axis=0)  # (N, D)
        ranks = _pallas_rank_counts(epoch_embeddings, self.examplesPerSequence)
        ranks_f = ranks.astype(jnp.float32)
        out = {
            # jnp.median matches np.median (the original module uses np.median).
            "MedR": jnp.median(ranks_f),
            "recall_at_1": jnp.mean((ranks == 0).astype(jnp.float32)),
            "recall_at_5": jnp.mean((ranks <= 4).astype(jnp.float32)),
            "recall_at_10": jnp.mean((ranks <= 9).astype(jnp.float32)),
        }
        self.allEmbeddings = []
        return out, ranks


def _reference_ranks(embeddings: np.ndarray, eps: int) -> np.ndarray:
    """NumPy mirror of the torch argsort-based path.

    The normalized embeddings are rounded to bfloat16 before the similarity
    matmul so the reference sees exactly the precision the kernel feeds the MXU
    (tie-breaking vs. the pure-f32 torch path is arbitrary anyway).
    """
    e = embeddings.astype(np.float32)
    norm = np.maximum(np.linalg.norm(e, axis=1, keepdims=True).astype(np.float32), 1e-12)
    en = e / norm
    en_q = np.asarray(jnp.asarray(en).astype(jnp.bfloat16).astype(jnp.float32))
    dist = (1.0 - en_q @ en_q.T).astype(np.float64)
    ranks = []
    for i in range(len(e) // eps):
        a = i * eps
        dist[a, a] = -1.0
        order = np.argsort(dist[a], kind="stable").tolist()
        ranks.append(order.index(a + 1) - 1)
    return np.asarray(ranks, dtype=np.int32)


if __name__ == "__main__":
    key = jax.random.PRNGKey(0)
    num_sequences = 8
    examples_per_sequence = 2
    hidden = 128
    n_total = num_sequences * examples_per_sequence  # 16 embeddings

    metric = EmbeddingsDistance(include_negative=False, mode="eval")

    # Simulate two forward() calls (two batches of embeddings).
    k1, k2 = jax.random.split(key)
    batch1 = jax.random.normal(k1, (n_total // 2, hidden), dtype=jnp.float32)
    batch2 = jax.random.normal(k2, (n_total // 2, hidden), dtype=jnp.float32)
    metric.forward(None, batch1, {"epoch_data": None})
    metric.forward(None, batch2, {"epoch_data": None})

    out, ranks = metric.calculate_MedR()
    jax.block_until_ready(ranks)
    for v in out.values():
        jax.block_until_ready(v)

    ref_ranks = _reference_ranks(
        np.concatenate([np.asarray(batch1), np.asarray(batch2)], axis=0),
        examples_per_sequence,
    )
    assert np.array_equal(np.asarray(ranks), ref_ranks), (np.asarray(ranks), ref_ranks)
    assert float(out["MedR"]) == float(np.median(ref_ranks))
    assert abs(float(out["recall_at_1"]) - float(np.mean(ref_ranks == 0))) < 1e-6
    assert abs(float(out["recall_at_5"]) - float(np.mean(ref_ranks <= 4))) < 1e-6
    assert abs(float(out["recall_at_10"]) - float(np.mean(ref_ranks <= 9))) < 1e-6

    print("KERNEL_OK")
</pallas_src>

<mosaic_0001>
module attributes {stable_mosaic.version = 11 : i64} {
  func.func @_rank_count_kernel(%arg0: i32, %arg1: i32, %arg2: memref<128x128xbf16, #tpu.memory_space<vmem>>, %arg3: memref<128x128xbf16, #tpu.memory_space<vmem>>, %arg4: memref<1x128xf32, #tpu.memory_space<vmem>>, %arg5: memref<1x128xf32, #tpu.memory_space<vmem>>) attributes {dimension_semantics = [#tpu.dimension_semantics<parallel>, #tpu.dimension_semantics<arbitrary>], iteration_bounds = array<i64: 1, 1>, scalar_prefetch = 0 : i64, scratch_operands = 0 : i64, tpu.core_type = #tpu.core_type<tc>, window_params = [{transform_indices = @transform_0, window_bounds = array<i64: 128, 128>}, {transform_indices = @transform_1, window_bounds = array<i64: 128, 128>}, {transform_indices = @transform_2, window_bounds = array<i64: 1, 128>}, {transform_indices = @transform_3, window_bounds = array<i64: 1, 128>}]} {
    %c0_i32 = arith.constant 0 : i32
    %0 = arith.cmpi eq, %arg1, %c0_i32 : i32
    %1 = arith.extui %0 : i1 to i32
    %c0_i32_0 = arith.constant 0 : i32
    %2 = arith.cmpi ne, %1, %c0_i32_0 : i32
    scf.if %2 {
      %cst_12 = arith.constant 0.000000e+00 : f32
      %40 = vector.broadcast %cst_12 : f32 to vector<1x128xf32>
      %c0_13 = arith.constant 0 : index
      %c0_14 = arith.constant 0 : index
      %41 = vector.load %arg5[%c0_13, %c0_14] : memref<1x128xf32, #tpu.memory_space<vmem>>, vector<1x128xf32>
      tpu.vector_store %arg5[%c0_13, %c0_14], %40 {strides = array<i32>} : memref<1x128xf32, #tpu.memory_space<vmem>>, vector<1x128xf32>,
    } else {
    }
    %c0 = arith.constant 0 : index
    %c0_1 = arith.constant 0 : index
    %3 = vector.load %arg3[%c0, %c0_1] : memref<128x128xbf16, #tpu.memory_space<vmem>>, vector<128x128xbf16>
    %c0_2 = arith.constant 0 : index
    %c0_3 = arith.constant 0 : index
    %4 = vector.load %arg2[%c0_2, %c0_3] : memref<128x128xbf16, #tpu.memory_space<vmem>>, vector<128x128xbf16>
    %cst = arith.constant dense<0.000000e+00> : vector<128x128xf32>
    %5 = tpu.matmul %3, %4, %cst {dimension_numbers = #tpu.dot_dimension_numbers<[1], [1], [0], [0], [0, 0, 1, 0], [], []>} : vector<128x128xbf16>, vector<128x128xbf16>, vector<128x128xf32> -> vector<128x128xf32>
    %c128_i32 = arith.constant 128 : i32
    %6 = arith.muli %arg1, %c128_i32 : i32
    %7 = tpu.iota {dimensions = array<i32: 0>} : vector<128x1xi32>
    %8 = vector.broadcast %6 : i32 to vector<128x1xi32>
    %9 = arith.addi %8, %7 : vector<128x1xi32>
    %c128_i32_4 = arith.constant 128 : i32
    %10 = arith.muli %arg0, %c128_i32_4 : i32
    %11 = tpu.iota {dimensions = array<i32: 1>} : vector<1x128xi32>
    %12 = vector.broadcast %10 : i32 to vector<1x128xi32>
    %13 = arith.addi %12, %11 : vector<1x128xi32>
    %c2_i32 = arith.constant 2 : i32
    %14 = vector.broadcast %c2_i32 : i32 to vector<1x128xi32>
    %15 = arith.muli %13, %14 : vector<1x128xi32>
    %16 = vector.broadcast %9 : vector<128x1xi32> to vector<128x128xi32>
    %17 = vector.broadcast %15 : vector<1x128xi32> to vector<128x128xi32>
    %18 = arith.cmpi ne, %16, %17 : vector<128x128xi32>
    %c1_i32 = arith.constant 1 : i32
    %19 = vector.broadcast %c1_i32 : i32 to vector<1x128xi32>
    %20 = arith.addi %15, %19 : vector<1x128xi32>
    %21 = vector.broadcast %9 : vector<128x1xi32> to vector<128x128xi32>
    %22 = vector.broadcast %20 : vector<1x128xi32> to vector<128x128xi32>
    %23 = arith.cmpi ne, %21, %22 : vector<128x128xi32>
    %24 = arith.andi %18, %23 : vector<128x128xi1>
    %c16_i32 = arith.constant 16 : i32
    %25 = vector.broadcast %c16_i32 : i32 to vector<128x1xi32>
    %26 = arith.cmpi slt, %9, %25 : vector<128x1xi32>
    %27 = vector.broadcast %26 : vector<128x1xi1> to vector<128x128xi1>
    %28 = arith.andi %24, %27 : vector<128x128xi1>
    %c0_5 = arith.constant 0 : index
    %c0_6 = arith.constant 0 : index
    %29 = vector.load %arg4[%c0_5, %c0_6] : memref<1x128xf32, #tpu.memory_space<vmem>>, vector<1x128xf32>
    %30 = vector.broadcast %29 : vector<1x128xf32> to vector<128x128xf32>
    %31 = arith.cmpf ogt, %5, %30 : vector<128x128xf32>
    %32 = arith.andi %28, %31 : vector<128x128xi1>
    %c0_7 = arith.constant 0 : index
    %c0_8 = arith.constant 0 : index
    %33 = vector.load %arg5[%c0_7, %c0_8] : memref<1x128xf32, #tpu.memory_space<vmem>>, vector<1x128xf32>
    %34 = arith.extui %32 : vector<128x128xi1> to vector<128x128xi32>
    %35 = arith.sitofp %34 : vector<128x128xi32> to vector<128x128xf32>
    %cst_9 = arith.constant dense<0.000000e+00> : vector<128xf32>
    %36 = vector.multi_reduction <add>, %35, %cst_9 [0] : vector<128x128xf32> to vector<128xf32>
    %37 = vector.shape_cast %36 : vector<128xf32> to vector<1x128xf32>
    %38 = arith.addf %33, %37 : vector<1x128xf32>
    %c0_10 = arith.constant 0 : index
    %c0_11 = arith.constant 0 : index
    %39 = vector.load %arg5[%c0_10, %c0_11] : memref<1x128xf32, #tpu.memory_space<vmem>>, vector<1x128xf32>
    tpu.vector_store %arg5[%c0_10, %c0_11], %38 {strides = array<i32>} : memref<1x128xf32, #tpu.memory_space<vmem>>, vector<1x128xf32>,
    return
  }
  func.func @transform_0(%arg0: i32, %arg1: i32) -> (i32, i32) {
    %c0_i32 = arith.constant 0 : i32
    %c0_i32_0 = arith.constant 0 : i32
    return %arg0, %c0_i32 : i32, i32
  }
  func.func @transform_1(%arg0: i32, %arg1: i32) -> (i32, i32) {
    %c0_i32 = arith.constant 0 : i32
    %c0_i32_0 = arith.constant 0 : i32
    return %arg1, %c0_i32 : i32, i32
  }
  func.func @transform_2(%arg0: i32, %arg1: i32) -> (i32, i32) {
    %c0_i32 = arith.constant 0 : i32
    %c0_i32_0 = arith.constant 0 : i32
    return %c0_i32, %arg0 : i32, i32
  }
  func.func @transform_3(%arg0: i32, %arg1: i32) -> (i32, i32) {
    %c0_i32 = arith.constant 0 : i32
    %c0_i32_0 = arith.constant 0 : i32
    return %c0_i32, %arg0 : i32, i32
  }
}

</mosaic_0001>

<bundles_post_ra>
// kernel: tpu_custom_call.1
= control target key start
LH: loop header
LB: loop body
LE: loop exit
PB: predicated region body
PF: predicated region fallthrough
CT: control target
= control target key end

     0   :  { %8 = vsyncpa [#allocation3], 0  ;;  %s748_s0 = inlined_call_operand.hbm [shape: bf16[128,128], index: 0, kind: input, shape index: {}]   ;;  %s749_s1 = inlined_call_operand.hbm [shape: bf16[128,128], index: 1, kind: input, shape index: {}]   ;;  %s750_s2 = inlined_call_operand.vmem [shape: f32[1,128], index: 2, kind: input, shape index: {}]   ;;  %s751_s3 = inlined_call_operand.hbm [shape: f32[1,128], index: 3, kind: output, shape index: {}]  }
   0x1   :  { %9 = vsyncpa [#allocation6], 0 }
   0x2   :  { %10 = vsyncpa [#allocation4], 0  ;;  %s710_s12 = smov [#allocation2]  }
   0x3   :  { %s16_s13 = sshll.u32 %s710_s12, 4  ;;  %s17_s13 = int_to_ptr.vmem [resolvable:$true] %s16_s13 }
   0x4   :  { %s652_s14 = scalar_lea.vmem %s17_s13, 1024  ;;  %p657_p1 = scmp.lt.s32.totalorder %s17_s13, %s17_s13 }
   0x5   :  { %p653_p0 = scmp.ne.s32.totalorder %s17_s13, %s652_s14  ;;  %p658_p2 = scmp.lt.s32.totalorder %s652_s14, %s652_s14 }
   0x7   :  { %p659_p3 = por %p658_p2, %p657_p1 }
   0x9   :  { %p660_p4 = pnand %p659_p3, %p653_p0 }
   0xb   :  { %663 = shalt.err (!%p660_p4)
}
   0xc   :  { %s711_s15 = smov 64   ;;  %s712_s16 = smov 4  }
   0xd   :  { %22 = dma.hbm_to_vmem [thread:$0]  %s748_s0, 1024, %s17_s13, [#allocation3], %s711_s15, %s711_s15, %s712_s16  }
   0xe   :  { %s713_s19 = smov [#allocation5]  }
   0xf   :  { %s28_s20 = sshll.u32 %s713_s19, 4  ;;  %s29_s20 = int_to_ptr.vmem [resolvable:$true] %s28_s20 }
  0x10   :  { %s672_s21 = scalar_lea.vmem %s29_s20, 1024  ;;  %p677_p6 = scmp.lt.s32.totalorder %s29_s20, %s29_s20 }
  0x11   :  { %p673_p5 = scmp.ne.s32.totalorder %s29_s20, %s672_s21  ;;  %p678_p7 = scmp.lt.s32.totalorder %s672_s21, %s672_s21 }
  0x13   :  { %p679_p8 = por %p678_p7, %p677_p6 }
  0x15   :  { %p680_p9 = pnand %p679_p8, %p673_p5 }
  0x17   :  { %683 = shalt.err (!%p680_p9)
}
  0x18   :  { %34 = dma.hbm_to_vmem [thread:$0]  %s749_s1, 1024, %s29_s20, [#allocation6], %s711_s15, %s711_s15, %s712_s16  }
  0x19   :  { %704 = dma.done.wait [#allocation3], 1024  }
  0x1a   :  { %705 = vsyncadd [#allocation3], 4294966272 }
  0x1b   :  { %706 = dma.done.wait [#allocation6], 1024  }
  0x1c   :  { %707 = vsyncadd [#allocation6], 4294966272  ;;  %v628_v0 = vld [vmem:[#allocation2 + $0x38] sm:$0xff]   ;;  %v629_v1 = vld [vmem:[#allocation2 + $0x30] sm:$0xff]   ;;  %v714_v16 = vmov 0.0   ;;  %v275_v17 = vlaneseq }
  0x1d   :  { %574 = vmatprep.subr.bf16.mxu0 %v628_v0  ;;  %606 = vmatprep.subr.bf16.mxu1 %v628_v0  ;;  %v630_v2 = vld [vmem:[#allocation2 + $0x28] sm:$0xff]   ;;  %v636_v3 = vld [vmem:[#allocation5] sm:$0xff]   ;;  %v632_v6 = vld [vmem:[#allocation2 + $0x18] sm:$0xff]   ;;  %48 = vst [vmem:[#allocation7] sm:$0x1] %v714_v16 }
  0x1e   :  { %575 = vmatpush3.bf16.xpose.msra.mxu0 %v628_v0  ;;  %614 = vmatpush3.bf16.xpose.msra.mxu1 %v628_v0  ;;  %v638_v4 = vld [vmem:[#allocation5 + $0x20] sm:$0xff]   ;;  %v633_v7 = vld [vmem:[#allocation2 + $0x10] sm:$0xff]   ;;  %v634_v8 = vld [vmem:[#allocation2 + $0x8] sm:$0xff]   ;;  %v311_v18 = vand.u32 127, %v275_v17  ;;  %v276_v20 = vshrl.u32 %v275_v17, 7 }
  0x1f   :  { %576 = vmatprep.subr.bf16.mxu0 %v629_v1  ;;  %607 = vmatprep.subr.bf16.mxu1 %v629_v1  ;;  %v631_v5 = vld [vmem:[#allocation2 + $0x20] sm:$0xff]   ;;  %v637_v10 = vld [vmem:[#allocation5 + $0x8] sm:$0xff]   ;;  %v640_v12 = vld [vmem:[#allocation5 + $0x10] sm:$0xff]  }
  0x20   :  { %590 = vmatprep.mubr.bf16.mxu0 %v636_v3  ;;  %598 = vmatprep.mubr.bf16.mxu1 %v638_v4  ;;  %v635_v9 = vld [vmem:[#allocation2] sm:$0xff]   ;;  %v639_v11 = vld [vmem:[#allocation5 + $0x28] sm:$0xff]   ;;  %v641_v13 = vld [vmem:[#allocation5 + $0x30] sm:$0xff]   ;;  %v314_v19 = vmul.u32 2, %v311_v18  ;;  %v277_v22 = vadd.s32 8, %v276_v20 }
  0x21   :  { %v642_v14 = vld [vmem:[#allocation5 + $0x18] sm:$0xff]   ;;  %v555_v24 = vld [vmem:[%s750_s2] ss:$0 sm:$0xff]  ;;  %s715_s2 = smov [#allocation7]  }
  0x22   :  { %v643_v15 = vld [vmem:[#allocation5 + $0x38] sm:$0xff]   ;;  %v331_v21 = vadd.s32 1, %v314_v19  ;;  %vm315_vm0 = vcmp.ne.s32.totalorder %v276_v20, %v314_v19  ;;  %vm316_vm2 = vcmp.ne.s32.totalorder %v277_v22, %v314_v19  ;;  %s529_s24 = sshll.u32 %s715_s2, 4  ;;  %s530_s24 = int_to_ptr.vmem [resolvable:$true] %s529_s24 }
  0x23   :  { %s684_s25 = scalar_lea.vmem %s530_s24, 16  ;;  %s688_s26 = scalar_lea.vmem %s530_s24, 32 }
  0x24   :  { %vm332_vm1 = vcmp.ne.s32.totalorder %v276_v20, %v331_v21  ;;  %vm333_vm3 = vcmp.ne.s32.totalorder %v277_v22, %v331_v21  ;;  %v467_v48 = vld [vmem:[#allocation7] sm:$0x1]  ;;  %p685_p10 = scmp.ne.s32.totalorder %s530_s24, %s684_s25  ;;  %p689_p11 = scmp.lt.s32.totalorder %s530_s24, %s530_s24 }
  0x25   :  { %vm348_vm4 = vmand %vm315_vm0, %vm332_vm1  ;;  %p690_p12 = scmp.lt.s32.totalorder %s688_s26, %s684_s25 }
  0x26   :  { %577 = vmatpush3.bf16.xpose.msra.mxu0 %v629_v1  ;;  %615 = vmatpush3.bf16.xpose.msra.mxu1 %v629_v1  ;;  %vm349_vm6 = vmand %vm316_vm2, %vm333_vm3 }
  0x27   :  { %578 = vmatprep.subr.bf16.mxu0 %v630_v2  ;;  %608 = vmatprep.subr.bf16.mxu1 %v630_v2  ;;  %p691_p13 = por %p690_p12, %p689_p11 }
  0x29   :  { %p692_p0 = pnand %p691_p13, %p685_p10 }
  0x2e   :  { %579 = vmatpush3.bf16.xpose.msra.mxu0 %v630_v2  ;;  %616 = vmatpush3.bf16.xpose.msra.mxu1 %v630_v2 }
  0x2f   :  { %580 = vmatprep.subr.bf16.mxu0 %v631_v5  ;;  %609 = vmatprep.subr.bf16.mxu1 %v631_v5 }
  0x36   :  { %581 = vmatpush3.bf16.xpose.msra.mxu0 %v631_v5  ;;  %617 = vmatpush3.bf16.xpose.msra.mxu1 %v631_v5 }
  0x37   :  { %582 = vmatprep.subr.bf16.mxu0 %v632_v6  ;;  %610 = vmatprep.subr.bf16.mxu1 %v632_v6 }
  0x3e   :  { %583 = vmatpush3.bf16.xpose.msra.mxu0 %v632_v6  ;;  %618 = vmatpush3.bf16.xpose.msra.mxu1 %v632_v6 }
  0x3f   :  { %584 = vmatprep.subr.bf16.mxu0 %v633_v7  ;;  %611 = vmatprep.subr.bf16.mxu1 %v633_v7 }
  0x46   :  { %585 = vmatpush3.bf16.xpose.msra.mxu0 %v633_v7  ;;  %619 = vmatpush3.bf16.xpose.msra.mxu1 %v633_v7 }
  0x47   :  { %586 = vmatprep.subr.bf16.mxu0 %v634_v8  ;;  %612 = vmatprep.subr.bf16.mxu1 %v634_v8 }
  0x4e   :  { %587 = vmatpush3.bf16.xpose.msra.mxu0 %v634_v8  ;;  %620 = vmatpush3.bf16.xpose.msra.mxu1 %v634_v8 }
  0x4f   :  { %588 = vmatprep.subr.bf16.mxu0 %v635_v9  ;;  %613 = vmatprep.subr.bf16.mxu1 %v635_v9 }
  0x56   :  { %589 = vmatpush3.bf16.xpose.msra.mxu0 %v635_v9  ;;  %621 = vmatpush3.bf16.xpose.msra.mxu1 %v635_v9 }
  0x5d   :  { %591 = vmatmul.mubr.bf16.vlgmr.msra.gmra.mxu0 %v637_v10  ;;  %599 = vmatmul.mubr.bf16.vlgmr.msra.gmra.mxu1 %v639_v11 }
  0x5e   :  { %594 = vmatprep.mubr.bf16.mxu0 %v640_v12  ;;  %602 = vmatprep.mubr.bf16.mxu1 %v641_v13 }
  0x65   :  { %595 = vmatmul.mubr.bf16.gmra.mxu0 %v642_v14  ;;  %603 = vmatmul.mubr.bf16.gmra.mxu1 %v643_v15 }
 0x11d   :  { %v592_v23 = vpop.f32.mrf.mxu0  ;;  %v600_v25 = vpop.f32.mrf.mxu1 }
 0x11f   :  { %v211_v26 = vpop.f32.mrf.mxu0  ;;  %v243_v27 = vpop.f32.mrf.mxu1 }
 0x120   :  { %vm435_vm5 = vcmp.gt.f32.partialorder %v211_v26, %v555_v24 }
 0x121   :  { %v593_v28 = vpop.f32.mrf.mxu0  ;;  %v601_v29 = vpop.f32.mrf.mxu1  ;;  %vm451_vm7 = vmand %vm348_vm4, %vm435_vm5 }
 0x122   :  { %v556_v34 = vsel %vm451_vm7, 1.0, %v714_v16 }
 0x123   :  { %v214_v30 = vpop.f32.mrf.mxu0  ;;  %v246_v31 = vpop.f32.mrf.mxu1 }
 0x124   :  { %vm436_vm8 = vcmp.gt.f32.partialorder %v214_v30, %v555_v24 }
 0x125   :  { %vm452_vm9 = vmand %vm349_vm6, %vm436_vm8  ;;  %v596_v32 = vpop.f32.mrf.mxu0  ;;  %v604_v33 = vpop.f32.mrf.mxu1 }
 0x126   :  { %v557_v35 = vsel %vm452_vm9, 1.0, %v714_v16 }
 0x127   :  { %v500_v36 = vadd.f32 %v557_v35, %v556_v34  ;;  %v227_v37 = vpop.f32.mrf.mxu0  ;;  %v259_v38 = vpop.f32.mrf.mxu1 }
 0x129   :  { %v515_v39 = vrot.slane %v500_v36, 4  ;;  %v597_v40 = vpop.f32.mrf.mxu0  ;;  %v605_v41 = vpop.f32.mrf.mxu1 }
 0x12b   :  { %v516_v42 = vadd.f32 %v515_v39, %v500_v36  ;;  %v230_v43 = vpop.f32.mrf.mxu0  ;;  %v262_v44 = vpop.f32.mrf.mxu1 }
 0x12d   :  { %v517_v45 = vrot.slane %v516_v42, 2 }
 0x12f   :  { %v518_v46 = vadd.f32 %v517_v45, %v516_v42 }
 0x131   :  { %v519_v47 = vrot.slane %v518_v46, 1 }
 0x133   :  { %v520_v49 = vadd.f32 %v519_v47, %v518_v46 }
 0x135   :  { %v521_v50 = vadd.f32 %v520_v49, %v467_v48 }
 0x137   :  { %522 = vst [vmem:[#allocation7] sm:$0x1] %v521_v50 }
 0x138   :  { %695 = shalt.err (!%p692_p0)
}
 0x139   :  { %532 = dma.vmem_to_hbm [thread:$0]  %s530_s24, 16, %s751_s3, [#allocation4]  }
 0x13a   :  { %708 = dma.done.wait [#allocation4], 16  }
 0x13b   :  { %709 = vsyncadd [#allocation4], 4294967280 }
 0x13c   :  { %536 = vsyncpa [#allocation3], 1 }
 0x13d   :  { %537 = vsyncpa [#allocation6], 1 }
 0x13e   :  { %538 = vsyncpa [#allocation4], 1 }

</bundles_post_ra>
